<compile_context>
chip_gen: v7x
topology: tpu7x:2x2x1
jax: 0.10.0
libtpu: 0.0.40
codegen_flags: <defaults>
</compile_context>

<pallas_src>
import functools

import jax
import jax.numpy as jnp
from jax.experimental import pallas as pl
from jax.experimental.pallas import tpu as pltpu


def _lrelu(v, slope=0.1):
    return jnp.where(v > 0, v, slope * v)


# --------------------------------------------------------------------------
# Kernel: one batch element, full (C, H*W) tile resident in VMEM.
# --------------------------------------------------------------------------
def rubik_kernel(x_ref, m_ref, s_ref, w_ref, b_ref, wo_ref, wop_ref, bo_ref,
                 o_ref, *, a1, a2, a3, a4):
    f32 = jnp.float32
    x = x_ref[0]                                    # (C, HW)

    def grp(k):
        # Sublane-aligned group extraction via a one-hot selection matmul
        # (avoids non-8-aligned sublane slicing of the packed (C, HW) tile).
        return jnp.dot(s_ref[k], x, preferred_element_type=f32)     # (gc, HW)

    # Rubik shifts == lane rolls over the flattened H*W axis + boundary masks
    #   group0: left  shift by shiftPixel along W
    #   group1: right shift by 1 along W
    #   group2: up    shift by 1 along H
    #   group3: down  shift by 1 along H
    c1 = pltpu.roll(grp(0), a1, axis=1) * m_ref[0]
    c2 = pltpu.roll(grp(1), a2, axis=1) * m_ref[1]
    c3 = pltpu.roll(grp(2), a3, axis=1) * m_ref[2]
    c4 = pltpu.roll(grp(3), a4, axis=1) * m_ref[3]

    # chained 1x1 convs (channel matmuls) with LeakyReLU(0.1)
    c1p = _lrelu(jnp.dot(w_ref[0], c1, preferred_element_type=f32) + b_ref[0])
    c2p = _lrelu(jnp.dot(w_ref[1], c1p * c2, preferred_element_type=f32) + b_ref[1])
    c3p = _lrelu(jnp.dot(w_ref[2], c2p * c3, preferred_element_type=f32) + b_ref[2])
    c4p = _lrelu(jnp.dot(w_ref[3], c3p * c4, preferred_element_type=f32) + b_ref[3])

    # output 1x1 conv as a sum of block matmuls; pass-through columns of wo
    # are folded into wop (zeros elsewhere) and applied directly to x.
    acc = jnp.dot(wop_ref[...], x, preferred_element_type=f32)
    acc = acc + jnp.dot(wo_ref[0], c1p, preferred_element_type=f32)
    acc = acc + jnp.dot(wo_ref[1], c2p, preferred_element_type=f32)
    acc = acc + jnp.dot(wo_ref[2], c3p, preferred_element_type=f32)
    acc = acc + jnp.dot(wo_ref[3], c4p, preferred_element_type=f32)

    o_ref[0] = _lrelu(acc + bo_ref[...]) + x        # residual add (out == nc)


# --------------------------------------------------------------------------
# pltpu.roll direction calibration (tiny probe kernel, run once, cached).
# --------------------------------------------------------------------------
_ROLL_IS_NUMPY = None


def _roll_is_numpy_convention():
    """True if pltpu.roll follows np.roll (out[i] = x[i - shift])."""
    global _ROLL_IS_NUMPY
    if _ROLL_IS_NUMPY is None:
        def probe(x_ref, o_ref):
            o_ref[...] = pltpu.roll(x_ref[...], 1, axis=1)
        x = jnp.arange(128, dtype=jnp.float32).reshape(1, 128)
        y = pl.pallas_call(
            probe, out_shape=jax.ShapeDtypeStruct((1, 128), jnp.float32))(x)
        _ROLL_IS_NUMPY = bool(jax.device_get(y)[0, 0] == 127.0)
    return _ROLL_IS_NUMPY


def _roll_amount(k, n, numpy_conv):
    """Static roll amount so that out[i] = v[(i + k) % n]."""
    return (-k) % n if numpy_conv else k % n


# --------------------------------------------------------------------------
# Wrapper
# --------------------------------------------------------------------------
def rubik_cube_multiply(x, params, *, shift_pixel=1, gc=4):
    """x: NCHW float32.  Returns NCHW float32 (out channels == nc)."""
    B, C, H, W = x.shape
    out_c = params["wo"].shape[0]
    assert out_c == C, "residual add requires out == nc"
    rem = C - 4 * gc
    assert rem > 0, "need pass-through channels (nc > 4*gc)"
    HW = H * W
    f32 = jnp.float32

    # (B, C, H, W) -> (B, C, H*W): free reshape, no transpose, no copy
    x3 = x.reshape(B, C, HW)

    # boundary masks for the four shifted groups, flattened to the lane axis
    w_ids = jnp.arange(W, dtype=jnp.int32)
    h_ids = jnp.arange(H, dtype=jnp.int32)
    mk = lambda m2d: m2d.astype(f32).reshape(1, HW)
    m1 = mk(jnp.broadcast_to((w_ids < W - shift_pixel)[None, :], (H, W)))
    m2 = mk(jnp.broadcast_to((w_ids >= 1)[None, :], (H, W)))
    m3 = mk(jnp.broadcast_to((h_ids < H - 1)[:, None], (H, W)))
    m4 = mk(jnp.broadcast_to((h_ids >= 1)[:, None], (H, W)))
    masks = jnp.stack([m1, m2, m3, m4])                                # (4,1,HW)

    # one-hot selection matrices for aligned group extraction            (4,gc,C)
    eye = jnp.eye(gc, dtype=f32)
    sel = jnp.zeros((4, gc, C), f32)
    for k in range(4):
        sel = sel.at[k, :, k * gc:(k + 1) * gc].set(eye)

    # pack weights into a handful of tiny, grid-resident streams
    w_stack = jnp.stack([params["w1"], params["w2"], params["w3"], params["w4"]])   # (4,gc,gc)
    b_stack = jnp.stack([params["b1"], params["b2"], params["b3"], params["b4"]])   # (4,gc,1)
    wo = params["wo"]
    wo_stack = jnp.stack([wo[:, i * gc:(i + 1) * gc] for i in range(4)])            # (4,out_c,gc)
    wo_pass = jnp.concatenate(
        [jnp.zeros((out_c, 4 * gc), f32), wo[:, 4 * gc:]], axis=1)                  # (out_c,C)
    bo = params["bo"]                                                               # (out_c,1)

    # static lane-roll amounts (direction calibrated once against pltpu.roll)
    numpy_conv = _roll_is_numpy_convention()
    amt = lambda k: _roll_amount(k, HW, numpy_conv)
    kernel = functools.partial(rubik_kernel,
                               a1=amt(shift_pixel), a2=amt(-1),
                               a3=amt(W), a4=amt(-W))

    const3 = lambda shape: pl.BlockSpec(shape, lambda b: (0, 0, 0))
    const2 = lambda shape: pl.BlockSpec(shape, lambda b: (0, 0))

    out = pl.pallas_call(
        kernel,
        out_shape=jax.ShapeDtypeStruct((B, out_c, HW), f32),
        grid=(B,),
        in_specs=[
            pl.BlockSpec((1, C, HW), lambda b: (b, 0, 0)),   # x (groups + residual)
            const3((4, 1, HW)),                              # boundary masks
            const3((4, gc, C)),                              # selection matrices
            const3((4, gc, gc)),                             # group conv weights
            const3((4, gc, 1)),                              # group conv biases
            const3((4, out_c, gc)),                          # wo column blocks 1..4
            const2((out_c, C)),                              # wo pass-through block
            const2((out_c, 1)),                              # bo
        ],
        out_specs=pl.BlockSpec((1, out_c, HW), lambda b: (b, 0, 0)),
        compiler_params=pltpu.CompilerParams(
            dimension_semantics=("parallel",)),
    )(x3, masks, sel, w_stack, b_stack, wo_stack, wo_pass, bo)

    # (B, out_c, H*W) -> (B, out_c, H, W): free reshape
    return out.reshape(B, out_c, H, W)


# ---------------- pure-JAX reference (for correctness check) ----------------
def shift_feat_ref(x, shift_pixel, g):
    # exact port of torch shift_feat (NCHW)
    out = jnp.zeros_like(x)
    out = out.at[:, 0 * g:1 * g, :, :-shift_pixel].set(x[:, 0 * g:1 * g, :, shift_pixel:])
    out = out.at[:, 1 * g:2 * g, :, 1:].set(x[:, 1 * g:2 * g, :, :-1])
    out = out.at[:, 2 * g:3 * g, :-1, :].set(x[:, 2 * g:3 * g, 1:, :])
    out = out.at[:, 3 * g:4 * g, 1:, :].set(x[:, 3 * g:4 * g, :-1, :])
    out = out.at[:, 4 * g:, :, :].set(x[:, 4 * g:, :, :])
    return out


def _conv1x1_lrelu_ref(x, w, b):
    # x: NCHW, w: (out, in), b: (out,)
    y = jnp.einsum("oi,bihw->bohw", w, x) + b[None, :, None, None]
    return _lrelu(y)


def rubik_cube_multiply_ref(x, params, *, shift_pixel=1, gc=4):
    residual = x
    xs = shift_feat_ref(x, shift_pixel, gc)
    c1, c2, c3, c4 = (xs[:, i * gc:(i + 1) * gc] for i in range(4))
    x2 = xs[:, 4 * gc:]
    c1p = _conv1x1_lrelu_ref(c1, params["w1"], params["b1"][:, 0])
    c2p = _conv1x1_lrelu_ref(c1p * c2, params["w2"], params["b2"][:, 0])
    c3p = _conv1x1_lrelu_ref(c2p * c3, params["w3"], params["b3"][:, 0])
    c4p = _conv1x1_lrelu_ref(c3p * c4, params["w4"], params["b4"][:, 0])
    full = jnp.concatenate([c1p, c2p, c3p, c4p, x2], axis=1)
    return _conv1x1_lrelu_ref(full, params["wo"], params["bo"][:, 0]) + residual


def init_params(key, nc, out_c, gc):
    ks = jax.random.split(key, 10)
    def w(k, o, i):
        return jax.random.normal(k, (o, i), jnp.float32) * 0.2
    def b(k, o):
        return jax.random.normal(k, (o, 1), jnp.float32) * 0.05
    return {
        "w1": w(ks[0], gc, gc), "b1": b(ks[1], gc),
        "w2": w(ks[2], gc, gc), "b2": b(ks[3], gc),
        "w3": w(ks[4], gc, gc), "b3": b(ks[5], gc),
        "w4": w(ks[6], gc, gc), "b4": b(ks[7], gc),
        "wo": w(ks[8], out_c, nc), "bo": b(ks[9], out_c),
    }


if __name__ == "__main__":
    B, nc, H, W = 2, 20, 16, 16      # nc = 4*gc + 4 pass-through channels
    gc, shift_pixel = 4, 1
    out_c = nc                       # residual add requires out == nc

    key = jax.random.PRNGKey(0)
    kx, kp = jax.random.split(key)
    x = jax.random.normal(kx, (B, nc, H, W), jnp.float32)
    params = init_params(kp, nc, out_c, gc)

    y = rubik_cube_multiply(x, params, shift_pixel=shift_pixel, gc=gc)
    y = jax.block_until_ready(y)

    y_ref = rubik_cube_multiply_ref(x, params, shift_pixel=shift_pixel, gc=gc)
    assert y.shape == (B, out_c, H, W)
    assert jnp.allclose(y, y_ref, atol=1e-5, rtol=1e-5)

    print("KERNEL_OK")
</pallas_src>

<mosaic_0001>
module attributes {stable_mosaic.version = 11 : i64} {
  func.func @probe(%arg0: memref<1x128xf32, #tpu.memory_space<vmem>>, %arg1: memref<1x128xf32, #tpu.memory_space<vmem>>) attributes {dimension_semantics = [], scalar_prefetch = 0 : i64, scratch_operands = 0 : i64, tpu.core_type = #tpu.core_type<tc>} {
    %c0 = arith.constant 0 : index
    %c0_0 = arith.constant 0 : index
    %0 = vector.load %arg0[%c0, %c0_0] : memref<1x128xf32, #tpu.memory_space<vmem>>, vector<1x128xf32>
    %c1_i32 = arith.constant 1 : i32
    %1 = tpu.dynamic_rotate %0 by %c1_i32 dim 1 : vector<1x128xf32>, i32 -> vector<1x128xf32>
    %c0_1 = arith.constant 0 : index
    %c0_2 = arith.constant 0 : index
    %2 = vector.load %arg1[%c0_1, %c0_2] : memref<1x128xf32, #tpu.memory_space<vmem>>, vector<1x128xf32>
    tpu.vector_store %arg1[%c0_1, %c0_2], %1 {strides = array<i32>} : memref<1x128xf32, #tpu.memory_space<vmem>>, vector<1x128xf32>,
    return
  }
}

</mosaic_0001>

<bundles_post_ra>
// kernel: tpu_custom_call.1
= control target key start
LH: loop header
LB: loop body
LE: loop exit
PB: predicated region body
PF: predicated region fallthrough
CT: control target
= control target key end

     0   :  { %6 = vsyncpa [#allocation3], 0  ;;  %s128_s0 = inlined_call_operand.hbm [shape: f32[1,128], index: 0, kind: input, shape index: {}]   ;;  %s129_s1 = inlined_call_operand.hbm [shape: f32[1,128], index: 1, kind: output, shape index: {}]  }
   0x1   :  { %7 = vsyncpa [#allocation4], 0  ;;  %s91_s6 = smov [#allocation2]   ;;  %s43_s10 = scalar_lea.hbm %s128_s0, 16 }
   0x2   :  { %s14_s7 = sshll.u32 %s91_s6, 4  ;;  %p44_p0 = scmp.ne.s32.totalorder %s128_s0, %s43_s10  ;;  %s15_s7 = int_to_ptr.vmem [resolvable:$true] %s14_s7 }
   0x3   :  { %p47_p1 = scmp.lt.u32.totalorder %s43_s10, %s128_s0 }
   0x5   :  { %p49_p2 = pnand %p47_p1, %p44_p0 }
   0x7   :  { %52 = shalt.err (!%p49_p2)
}
   0x8   :  { %s53_s15 = scalar_lea.vmem %s15_s7, 16  ;;  %s57_s16 = scalar_lea.vmem %s15_s7, 32 }
   0x9   :  { %p54_p3 = scmp.ne.s32.totalorder %s15_s7, %s53_s15  ;;  %p58_p4 = scmp.lt.s32.totalorder %s15_s7, %s15_s7 }
   0xa   :  { %p59_p5 = scmp.lt.s32.totalorder %s57_s16, %s53_s15 }
   0xc   :  { %p60_p6 = por %p59_p5, %p58_p4 }
   0xe   :  { %p61_p7 = pnand %p60_p6, %p54_p3 }
  0x10   :  { %64 = shalt.err (!%p61_p7)
}
  0x11   :  { %17 = dma.hbm_to_vmem [thread:$0]  %s128_s0, 16, %s15_s7, [#allocation3]  }
  0x12   :  { %87 = dma.done.wait [#allocation3], 16  }
  0x13   :  { %88 = vsyncadd [#allocation3], 4294967280  ;;  %v21_v0 = vld [vmem:[#allocation2] sm:$0x1]  ;;  %s92_s19 = smov 1   ;;  %s93_s20 = smov [#allocation5]  }
  0x14   :  { %22 = vrot.lane.b32.xlu0 %v21_v0, %s92_s19  ;;  %s31_s21 = sshll.u32 %s93_s20, 4  ;;  %s32_s21 = int_to_ptr.vmem [resolvable:$true] %s31_s21 }
  0x15   :  { %s65_s22 = scalar_lea.vmem %s32_s21, 16  ;;  %s69_s23 = scalar_lea.vmem %s32_s21, 32 }
  0x16   :  { %p66_p8 = scmp.ne.s32.totalorder %s32_s21, %s65_s22  ;;  %p70_p9 = scmp.lt.s32.totalorder %s32_s21, %s32_s21 }
  0x17   :  { %p71_p10 = scmp.lt.s32.totalorder %s69_s23, %s65_s22 }
  0x19   :  { %p72_p11 = por %p71_p10, %p70_p9 }
  0x1b   :  { %p73_p12 = pnand %p72_p11, %p66_p8 }
  0x86   :  { %v23_v1 = vpop.permute.xlu0 %22 }
  0x87   :  { %24 = vst [vmem:[#allocation5] sm:$0x1] %v23_v1 }
  0x88   :  { %76 = shalt.err (!%p73_p12)
}
  0x89   :  { %s77_s25 = scalar_lea.hbm %s129_s1, 16 }
  0x8a   :  { %p78_p13 = scmp.ne.s32.totalorder %s129_s1, %s77_s25  ;;  %p81_p0 = scmp.lt.u32.totalorder %s77_s25, %s129_s1 }
  0x8c   :  { %p83_p1 = pnand %p81_p0, %p78_p13 }
  0x8e   :  { %86 = shalt.err (!%p83_p1)
}
  0x8f   :  { %34 = dma.vmem_to_hbm [thread:$0]  %s32_s21, 16, %s129_s1, [#allocation4]  }
  0x90   :  { %89 = dma.done.wait [#allocation4], 16  }
  0x91   :  { %90 = vsyncadd [#allocation4], 4294967280 }
  0x92   :  { %38 = vsyncpa [#allocation3], 1 }
  0x93   :  { %39 = vsyncpa [#allocation4], 1 }

</bundles_post_ra>
